<compile_context>
chip_gen: v7x
topology: tpu7x:2x2x1
jax: 0.10.0
libtpu: 0.0.40
codegen_flags: <defaults>
</compile_context>

<pallas_src>
import functools

import jax
import jax.numpy as jnp
from jax.experimental import pallas as pl
from jax.experimental.pallas import tpu as pltpu

EPS = 1e-12


def _round_up(x, m):
    return ((x + m - 1) // m) * m


def _output_kernel(h_ref, x_ref, w_ref, b_ref, g_ref, beta_ref, o_ref):
    # h_ref: (TM, K) dense input tile (hidden_states, flattened rows)
    # x_ref: (TM, N) residual tile (input_tensor)
    # w_ref: (K, N)  dense weight, pre-transposed, resident across all tiles
    # b_ref, g_ref, beta_ref: (1, N) bias / LayerNorm gamma / LayerNorm beta
    # o_ref: (TM, N) output tile

    # Linear: MXU matmul in the operands' native dtype, f32 accumulation.
    y = jnp.dot(h_ref[...], w_ref[...], preferred_element_type=jnp.float32)
    y = y + b_ref[...].astype(jnp.float32)

    # TODO(synk): training-mode dropout would need pltpu.prng_random_bits + mask;
    # eval/inference dropout is the identity, which is what we implement here.

    # Residual add (f32 accumulator math).
    y = y + x_ref[...].astype(jnp.float32)

    # LayerNorm over the last dim (biased variance, eps inside the sqrt),
    # single-pass moments + rsqrt on the EUP.
    inv_n = jnp.float32(1.0 / y.shape[-1])
    mean = jnp.sum(y, axis=-1, keepdims=True) * inv_n
    mean_sq = jnp.sum(y * y, axis=-1, keepdims=True) * inv_n
    var = jnp.maximum(mean_sq - mean * mean, 0.0)
    y = (y - mean) * jax.lax.rsqrt(var + EPS)

    o_ref[...] = (g_ref[...].astype(jnp.float32) * y
                  + beta_ref[...].astype(jnp.float32)).astype(o_ref.dtype)


@functools.partial(jax.jit, static_argnames=("row_tile",))
def output_forward(hidden_states, input_tensor, w_kn, b, gamma, beta,
                   *, row_tile=256):
    """Fused Linear + residual + LayerNorm.

    hidden_states: (B, S, K)
    input_tensor:  (B, S, N)
    w_kn:          (K, N)   dense weight, already transposed from torch (N, K)
    b, gamma, beta: (N,)
    """
    B, S, K = hidden_states.shape
    N = input_tensor.shape[-1]
    M = B * S

    # Row tile: multiple of 8 (sublane rule), capped by the (padded) problem size.
    TM = min(row_tile, _round_up(M, 8))
    M_pad = _round_up(M, TM)

    h2 = hidden_states.reshape(M, K)
    x2 = input_tensor.reshape(M, N)
    if M_pad != M:
        h2 = jnp.pad(h2, ((0, M_pad - M), (0, 0)))
        x2 = jnp.pad(x2, ((0, M_pad - M), (0, 0)))

    b2 = b.reshape(1, N)
    g2 = gamma.reshape(1, N)
    beta2 = beta.reshape(1, N)

    itemsize = jnp.dtype(hidden_states.dtype).itemsize
    cost = pl.CostEstimate(
        flops=2 * M_pad * K * N,
        transcendentals=0,
        bytes_accessed=(M_pad * K + M_pad * N + K * N + 3 * N) * itemsize
        + M_pad * N * itemsize,
    )

    out = pl.pallas_call(
        _output_kernel,
        out_shape=jax.ShapeDtypeStruct((M_pad, N), hidden_states.dtype),
        grid=(M_pad // TM,),
        in_specs=[
            pl.BlockSpec((TM, K), lambda i: (i, 0)),   # hidden_states tile
            pl.BlockSpec((TM, N), lambda i: (i, 0)),   # residual tile
            pl.BlockSpec((K, N), lambda i: (0, 0)),    # weight (resident)
            pl.BlockSpec((1, N), lambda i: (0, 0)),    # bias (resident)
            pl.BlockSpec((1, N), lambda i: (0, 0)),    # gamma (resident)
            pl.BlockSpec((1, N), lambda i: (0, 0)),    # beta (resident)
        ],
        out_specs=pl.BlockSpec((TM, N), lambda i: (i, 0)),
        compiler_params=pltpu.CompilerParams(
            dimension_semantics=("parallel",),
            vmem_limit_bytes=48 * 1024 * 1024,
        ),
        cost_estimate=cost,
    )(h2, x2, w_kn, b2, g2, beta2)

    if M_pad != M:
        out = out[:M]
    return out.reshape(B, S, N)


def reference_forward(hidden_states, input_tensor, w_nk, b, gamma, beta):
    y = jnp.einsum("bsk,nk->bsn", hidden_states, w_nk) + b
    y = y + input_tensor
    u = jnp.mean(y, axis=-1, keepdims=True)
    s = jnp.mean((y - u) ** 2, axis=-1, keepdims=True)
    y = (y - u) / jnp.sqrt(s + EPS)
    return gamma * y + beta


if __name__ == "__main__":
    B, S = 2, 8
    intermediate_size = 64
    hidden_size = 32

    key = jax.random.PRNGKey(0)
    k1, k2, k3, k4 = jax.random.split(key, 4)

    hidden_states = jax.random.normal(k1, (B, S, intermediate_size), jnp.float32)
    input_tensor = jax.random.normal(k2, (B, S, hidden_size), jnp.float32)

    # Deterministic parameter init (nn.Linear-style fan-in scaling), torch layout.
    bound = 1.0 / (intermediate_size ** 0.5)
    w_nk = jax.random.uniform(k3, (hidden_size, intermediate_size), jnp.float32,
                              minval=-bound, maxval=bound)
    b = jax.random.uniform(k4, (hidden_size,), jnp.float32,
                           minval=-bound, maxval=bound)
    gamma = jnp.ones((hidden_size,), jnp.float32)
    beta = jnp.zeros((hidden_size,), jnp.float32)

    # Transpose the weight ONCE (model-load time), not per forward call.
    w_kn = jnp.asarray(w_nk.T)  # (K, N)

    out = output_forward(hidden_states, input_tensor, w_kn, b, gamma, beta)
    out = jax.block_until_ready(out)

    ref = reference_forward(hidden_states, input_tensor, w_nk, b, gamma, beta)
    assert out.shape == (B, S, hidden_size)
    assert jnp.allclose(out, ref, atol=1e-4, rtol=1e-4), "mismatch vs reference"

    print("KERNEL_OK")
</pallas_src>

<mosaic_0001>
module attributes {stable_mosaic.version = 11 : i64} {
  func.func @_output_kernel(%arg0: i32, %arg1: memref<16x64xf32, #tpu.memory_space<vmem>>, %arg2: memref<16x32xf32, #tpu.memory_space<vmem>>, %arg3: memref<64x32xf32, #tpu.memory_space<vmem>>, %arg4: memref<1x32xf32, #tpu.memory_space<vmem>>, %arg5: memref<1x32xf32, #tpu.memory_space<vmem>>, %arg6: memref<1x32xf32, #tpu.memory_space<vmem>>, %arg7: memref<16x32xf32, #tpu.memory_space<vmem>>) attributes {dimension_semantics = [#tpu.dimension_semantics<parallel>], iteration_bounds = array<i64: 1>, scalar_prefetch = 0 : i64, scratch_operands = 0 : i64, tpu.core_type = #tpu.core_type<tc>, window_params = [{transform_indices = @transform_0, window_bounds = array<i64: 16, 64>}, {transform_indices = @transform_1, window_bounds = array<i64: 16, 32>}, {pipeline_mode = #tpu.pipeline_mode<synchronous>, transform_indices = @transform_2, window_bounds = array<i64: 64, 32>}, {pipeline_mode = #tpu.pipeline_mode<synchronous>, transform_indices = @transform_3, window_bounds = array<i64: 1, 32>}, {pipeline_mode = #tpu.pipeline_mode<synchronous>, transform_indices = @transform_4, window_bounds = array<i64: 1, 32>}, {pipeline_mode = #tpu.pipeline_mode<synchronous>, transform_indices = @transform_5, window_bounds = array<i64: 1, 32>}, {transform_indices = @transform_6, window_bounds = array<i64: 16, 32>}]} {
    %c0 = arith.constant 0 : index
    %c0_0 = arith.constant 0 : index
    %0 = vector.load %arg1[%c0, %c0_0] : memref<16x64xf32, #tpu.memory_space<vmem>>, vector<16x64xf32>
    %c0_1 = arith.constant 0 : index
    %c0_2 = arith.constant 0 : index
    %1 = vector.load %arg3[%c0_1, %c0_2] : memref<64x32xf32, #tpu.memory_space<vmem>>, vector<64x32xf32>
    %cst = arith.constant dense<0.000000e+00> : vector<16x32xf32>
    %2 = tpu.matmul %0, %1, %cst {dimension_numbers = #tpu.dot_dimension_numbers<[1], [0], [0], [1], [0, 0, 1, 1], [], []>} : vector<16x64xf32>, vector<64x32xf32>, vector<16x32xf32> -> vector<16x32xf32>
    %c0_3 = arith.constant 0 : index
    %c0_4 = arith.constant 0 : index
    %3 = vector.load %arg4[%c0_3, %c0_4] : memref<1x32xf32, #tpu.memory_space<vmem>>, vector<1x32xf32>
    %4 = vector.broadcast %3 : vector<1x32xf32> to vector<16x32xf32>
    %5 = arith.addf %2, %4 : vector<16x32xf32>
    %c0_5 = arith.constant 0 : index
    %c0_6 = arith.constant 0 : index
    %6 = vector.load %arg2[%c0_5, %c0_6] : memref<16x32xf32, #tpu.memory_space<vmem>>, vector<16x32xf32>
    %7 = arith.addf %5, %6 : vector<16x32xf32>
    %cst_7 = arith.constant dense<0.000000e+00> : vector<16xf32>
    %8 = vector.multi_reduction <add>, %7, %cst_7 [1] : vector<16x32xf32> to vector<16xf32>
    %9 = vector.shape_cast %8 : vector<16xf32> to vector<16x1xf32>
    %cst_8 = arith.constant 3.125000e-02 : f32
    %10 = vector.broadcast %cst_8 : f32 to vector<16x1xf32>
    %11 = arith.mulf %9, %10 : vector<16x1xf32>
    %12 = arith.mulf %7, %7 : vector<16x32xf32>
    %cst_9 = arith.constant dense<0.000000e+00> : vector<16xf32>
    %13 = vector.multi_reduction <add>, %12, %cst_9 [1] : vector<16x32xf32> to vector<16xf32>
    %14 = vector.shape_cast %13 : vector<16xf32> to vector<16x1xf32>
    %cst_10 = arith.constant 3.125000e-02 : f32
    %15 = vector.broadcast %cst_10 : f32 to vector<16x1xf32>
    %16 = arith.mulf %14, %15 : vector<16x1xf32>
    %17 = arith.mulf %11, %11 : vector<16x1xf32>
    %18 = arith.subf %16, %17 : vector<16x1xf32>
    %cst_11 = arith.constant 0.000000e+00 : f32
    %19 = vector.broadcast %cst_11 : f32 to vector<16x1xf32>
    %20 = arith.maximumf %18, %19 : vector<16x1xf32>
    %21 = vector.broadcast %11 : vector<16x1xf32> to vector<16x32xf32>
    %22 = arith.subf %7, %21 : vector<16x32xf32>
    %cst_12 = arith.constant 9.99999996E-13 : f32
    %23 = vector.broadcast %cst_12 : f32 to vector<16x1xf32>
    %24 = arith.addf %20, %23 : vector<16x1xf32>
    %25 = math.rsqrt %24 : vector<16x1xf32>
    %26 = vector.broadcast %25 : vector<16x1xf32> to vector<16x32xf32>
    %27 = arith.mulf %22, %26 : vector<16x32xf32>
    %c0_13 = arith.constant 0 : index
    %c0_14 = arith.constant 0 : index
    %28 = vector.load %arg5[%c0_13, %c0_14] : memref<1x32xf32, #tpu.memory_space<vmem>>, vector<1x32xf32>
    %29 = vector.broadcast %28 : vector<1x32xf32> to vector<16x32xf32>
    %30 = arith.mulf %29, %27 : vector<16x32xf32>
    %c0_15 = arith.constant 0 : index
    %c0_16 = arith.constant 0 : index
    %31 = vector.load %arg6[%c0_15, %c0_16] : memref<1x32xf32, #tpu.memory_space<vmem>>, vector<1x32xf32>
    %32 = vector.broadcast %31 : vector<1x32xf32> to vector<16x32xf32>
    %33 = arith.addf %30, %32 : vector<16x32xf32>
    %c0_17 = arith.constant 0 : index
    %c0_18 = arith.constant 0 : index
    %34 = vector.load %arg7[%c0_17, %c0_18] : memref<16x32xf32, #tpu.memory_space<vmem>>, vector<16x32xf32>
    tpu.vector_store %arg7[%c0_17, %c0_18], %33 {strides = array<i32>} : memref<16x32xf32, #tpu.memory_space<vmem>>, vector<16x32xf32>,
    return
  }
  func.func @transform_0(%arg0: i32) -> (i32, i32) {
    %c0_i32 = arith.constant 0 : i32
    %c0_i32_0 = arith.constant 0 : i32
    return %arg0, %c0_i32 : i32, i32
  }
  func.func @transform_1(%arg0: i32) -> (i32, i32) {
    %c0_i32 = arith.constant 0 : i32
    %c0_i32_0 = arith.constant 0 : i32
    return %arg0, %c0_i32 : i32, i32
  }
  func.func @transform_2(%arg0: i32) -> (i32, i32) {
    %c0_i32 = arith.constant 0 : i32
    %c0_i32_0 = arith.constant 0 : i32
    %c0_i32_1 = arith.constant 0 : i32
    return %c0_i32, %c0_i32_0 : i32, i32
  }
  func.func @transform_3(%arg0: i32) -> (i32, i32) {
    %c0_i32 = arith.constant 0 : i32
    %c0_i32_0 = arith.constant 0 : i32
    %c0_i32_1 = arith.constant 0 : i32
    return %c0_i32, %c0_i32_0 : i32, i32
  }
  func.func @transform_4(%arg0: i32) -> (i32, i32) {
    %c0_i32 = arith.constant 0 : i32
    %c0_i32_0 = arith.constant 0 : i32
    %c0_i32_1 = arith.constant 0 : i32
    return %c0_i32, %c0_i32_0 : i32, i32
  }
  func.func @transform_5(%arg0: i32) -> (i32, i32) {
    %c0_i32 = arith.constant 0 : i32
    %c0_i32_0 = arith.constant 0 : i32
    %c0_i32_1 = arith.constant 0 : i32
    return %c0_i32, %c0_i32_0 : i32, i32
  }
  func.func @transform_6(%arg0: i32) -> (i32, i32) {
    %c0_i32 = arith.constant 0 : i32
    %c0_i32_0 = arith.constant 0 : i32
    return %arg0, %c0_i32 : i32, i32
  }
}

</mosaic_0001>

<bundles_post_ra>
// kernel: output_forward.1
= control target key start
LH: loop header
LB: loop body
LE: loop exit
PB: predicated region body
PF: predicated region fallthrough
CT: control target
= control target key end

     0   :  { %vm41_vm0 = vcmask 523264   ;;  %s380_s0 = inlined_call_operand.vmem [shape: f32[16,64], index: 0, kind: input, shape index: {}]   ;;  %s381_s1 = inlined_call_operand.vmem [shape: f32[16,32], index: 1, kind: input, shape index: {}]   ;;  %s382_s2 = inlined_call_operand.vmem [shape: f32[64,32], index: 2, kind: input, shape index: {}]   ;;  %s383_s3 = inlined_call_operand.vmem [shape: f32[1,32], index: 3, kind: input, shape index: {}]   ;;  %s384_s4 = inlined_call_operand.vmem [shape: f32[1,32], index: 4, kind: input, shape index: {}]   ;;  %s385_s5 = inlined_call_operand.vmem [shape: f32[1,32], index: 5, kind: input, shape index: {}]   ;;  %s386_s6 = inlined_call_operand.hbm [shape: f32[16,32], index: 6, kind: output, shape index: {}]  }
   0x1   :  { %v26_v0 = vld [vmem:[%s382_s2] sm:$0xff]  ;;  %v27_v1 = vld [vmem:[%s382_s2 + $0x8] sm:$0xff]  ;;  %v28_v2 = vld [vmem:[%s382_s2 + $0x10] sm:$0xff] }
   0x2   :  { %v230_v3 = vpack.c.bf16 %v27_v1, %v26_v0  ;;  %v29_v4 = vld [vmem:[%s382_s2 + $0x18] sm:$0xff]  ;;  %v30_v6 = vld [vmem:[%s382_s2 + $0x20] sm:$0xff]  ;;  %v31_v7 = vld [vmem:[%s382_s2 + $0x28] sm:$0xff] }
   0x3   :  { %v234_v5 = vpack.c.bf16 %v29_v4, %v28_v2  ;;  %v24_v8 = vld [vmem:[%s380_s0] sm:$0xff] }
   0x4   :  { %231 = vmatprep.subr.bf16.mxu0 %v230_v3  ;;  %227 = vmatprep.mubr.msk.f32.mxu0 %vm41_vm0, %v24_v8 }
   0x5   :  { %11 = vsyncpa [#allocation3], 0  ;;  %233 = vmatpush3.bf16.msra.mxu0 %v230_v3  ;;  %v238_v9 = vpack.c.bf16 %v31_v7, %v30_v6  ;;  %v32_v10 = vld [vmem:[%s382_s2 + $0x30] sm:$0xff]  ;;  %v33_v11 = vld [vmem:[%s382_s2 + $0x38] sm:$0xff]  ;;  %vm127_vm1 = vcmask 261120   ;;  %s277_s23 = smov [#allocation2]  }
   0x6   :  { %235 = vmatprep.subr.bf16.mxu0 %v234_v5  ;;  %v242_v12 = vpack.c.bf16 %v33_v11, %v32_v10  ;;  %v25_v13 = vld [vmem:[%s380_s0 + $0x8] sm:$0xff]  ;;  %v196_v14 = vld [vmem:[%s383_s3] ss:$0 sm:$0xff]  ;;  %s185_s24 = sshll.u32 %s277_s23, 4  ;;  %s186_s24 = int_to_ptr.vmem [resolvable:$true] %s185_s24 }
   0x7   :  { %v124_v17 = vld [vmem:[%s381_s1 + $0x8] sm:$0xff]  ;;  %v123_v19 = vld [vmem:[%s381_s1] sm:$0xff]  ;;  %p258_p1 = scmp.lt.s32.totalorder %s186_s24, %s186_s24 }
   0x8   :  { %v199_v47 = vld [vmem:[%s384_s4] ss:$0 sm:$0xff]  ;;  %s253_s4 = scalar_lea.vmem %s186_s24, 256 }
   0x9   :  { %237 = vmatpush3.bf16.msra.mxu0 %v234_v5  ;;  %v200_v49 = vld [vmem:[%s385_s5] ss:$0 sm:$0xff]  ;;  %p254_p0 = scmp.ne.s32.totalorder %s186_s24, %s253_s4  ;;  %p259_p2 = scmp.lt.s32.totalorder %s253_s4, %s253_s4 }
   0xa   :  { %239 = vmatprep.subr.bf16.mxu0 %v238_v9 }
   0xb   :  { %p260_p3 = por %p259_p2, %p258_p1 }
   0xd   :  { %241 = vmatpush3.bf16.msra.mxu0 %v238_v9  ;;  %p261_p4 = pnand %p260_p3, %p254_p0 }
   0xe   :  { %243 = vmatprep.subr.bf16.mxu0 %v242_v12 }
  0x11   :  { %245 = vmatpush3.bf16.msra.mxu0 %v242_v12 }
  0x14   :  { %228 = vmatmul.mubr.msk.f32.vlgmr.msra.gmra.mrb[0].mxu0 %vm41_vm0, %v25_v13 }
  0xe7   :  { %v229_v15 = vpop.f32.mrb[0].mxu0 }
  0xe8   :  { %v120_v16 = vadd.f32 %v229_v15, %v196_v14  ;;  %v114_v18 = vpop.f32.mrb[1].mxu0 }
  0xe9   :  { %v115_v20 = vadd.f32 %v196_v14, %v114_v18 }
  0xea   :  { %v126_v21 = vadd.f32 %v124_v17, %v120_v16 }
  0xeb   :  { %v125_v22 = vadd.f32 %v123_v19, %v115_v20 }
  0xec   :  { %v137_v26 = vmul.f32 %v126_v21, %v126_v21  ;;  %v131_v27 = vsel %vm127_vm1, %v126_v21, 0.0 }
  0xed   :  { %v128_v23 = vsel %vm127_vm1, %v125_v22, 0.0  ;;  %v136_v24 = vmul.f32 %v125_v22, %v125_v22 }
  0xee   :  { %129 = vadd.xlane.f32.xlu0 %v128_v23  ;;  %v141_v28 = vsel %vm127_vm1, %v137_v26, 0.0 }
  0xef   :  { %v138_v25 = vsel %vm127_vm1, %v136_v24, 0.0 }
  0xf0   :  { %139 = vadd.xlane.f32.xlu1 %v138_v25 }
  0xf2   :  { %132 = vadd.xlane.f32.xlu0 %v131_v27 }
  0xf4   :  { %142 = vadd.xlane.f32.xlu1 %v141_v28 }
 0x17b   :  { %v130_v29 = vpop.xlane.xlu0 %129 }
 0x17c   :  { %v134_v30 = vmul.f32 0.03125, %v130_v29 }
 0x17d   :  { %v140_v31 = vpop.xlane.xlu1 %139 }
 0x17e   :  { %v146_v32 = vmul.f32 %v134_v30, %v134_v30  ;;  %v144_v33 = vmul.f32 0.03125, %v140_v31  ;;  %v152_v45 = vsub.f32 %v125_v22, %v134_v30 }
 0x17f   :  { %v133_v34 = vpop.xlane.xlu0 %132 }
 0x180   :  { %v148_v35 = vsub.f32 %v144_v33, %v146_v32  ;;  %v135_v36 = vmul.f32 0.03125, %v133_v34 }
 0x181   :  { %v143_v37 = vpop.xlane.xlu1 %142 }
 0x182   :  { %v150_v38 = vmax.f32 %v148_v35, 0.0  ;;  %v147_v39 = vmul.f32 %v135_v36, %v135_v36  ;;  %v145_v40 = vmul.f32 0.03125, %v143_v37  ;;  %v153_v50 = vsub.f32 %v126_v21, %v135_v36 }
 0x184   :  { %v154_v41 = vadd.f32 1e-12, %v150_v38  ;;  %v149_v42 = vsub.f32 %v145_v40, %v147_v39 }
 0x186   :  { %249 = vrsqrt.f32 %v154_v41  ;;  %v151_v43 = vmax.f32 %v149_v42, 0.0 }
 0x188   :  { %v155_v44 = vadd.f32 1e-12, %v151_v43 }
 0x18a   :  { %251 = vrsqrt.f32 %v155_v44 }
 0x190   :  { %v250_v46 = vpop.eup %249 }
 0x191   :  { %v158_v48 = vmul.f32 %v250_v46, %v152_v45 }
 0x193   :  { %v167_v51 = vmul.f32 %v199_v47, %v158_v48 }
 0x194   :  { %v252_v52 = vpop.eup %251 }
 0x195   :  { %v159_v53 = vmul.f32 %v252_v52, %v153_v50  ;;  %v176_v54 = vadd.f32 %v200_v49, %v167_v51 }
 0x197   :  { %v168_v55 = vmul.f32 %v199_v47, %v159_v53  ;;  %178 = vst.msk [vmem:[#allocation2] sm:$0xff] %vm127_vm1, %v176_v54 }
 0x199   :  { %v177_v56 = vadd.f32 %v200_v49, %v168_v55 }
 0x19b   :  { %179 = vst.msk [vmem:[#allocation2 + $0x8] sm:$0xff] %vm127_vm1, %v177_v56 }
 0x19c   :  { %264 = shalt.err (!%p261_p4)
}
 0x19d   :  { %s265_s26 = scalar_lea.hbm %s386_s6, 256 }
 0x19e   :  { %p266_p5 = scmp.ne.s32.totalorder %s386_s6, %s265_s26  ;;  %p269_p6 = scmp.lt.u32.totalorder %s265_s26, %s386_s6 }
 0x1a0   :  { %p271_p7 = pnand %p269_p6, %p266_p5 }
 0x1a2   :  { %274 = shalt.err (!%p271_p7)
}
 0x1a3   :  { %s278_s7 = smov 128   ;;  %s279_s8 = smov 8  }
 0x1a4   :  { %191 = dma.vmem_to_hbm [thread:$0]  %s186_s24, 256, %s386_s6, [#allocation3], %s278_s7, %s278_s7, %s279_s8  }
 0x1a5   :  { %275 = dma.done.wait [#allocation3], 256  }
 0x1a6   :  { %276 = vsyncadd [#allocation3], 4294967040 }
 0x1a7   :  { %195 = vsyncpa [#allocation3], 1 }

</bundles_post_ra>
